<compile_context>
chip_gen: v7x
topology: tpu7x:2x2x1
jax: 0.10.0
libtpu: 0.0.40
codegen_flags: <defaults>
</compile_context>

<pallas_src>
import functools

import jax
import jax.numpy as jnp
from jax.experimental import pallas as pl
from jax.experimental.pallas import tpu as pltpu


def _mish_fast(v):
    """Mish(v) = v * tanh(softplus(v)) using a single exp + approx reciprocal.

    With e = exp(v): tanh(log(1+e)) = e*(e+2) / (e*(e+2) + 2).
    Clamp the exp argument at 30 so e*(e+2) stays finite in f32; for v > 30 the
    expression is already == v to f32 precision. For v -> -inf, e -> 0 and the
    result -> v * e -> 0 (no NaN for finite inputs).
    """
    e = jnp.exp(jnp.minimum(v, 30.0))
    p = e * (e + 2.0)
    return v * (p * pl.reciprocal(p + 2.0, approx=True))


def _cond_mlp_kernel(x_ref, c_ref, wx_ref, wc_ref, b_in_ref,
                     w_h_ref, b_h_ref, w_out_ref, b_out_ref, o_ref):
    # First layer: [x, c] @ W_in + b  computed as  x @ W_x + c @ W_c + b
    # (avoids a wrapper-side concatenate that would round-trip through HBM).
    h = (jnp.dot(x_ref[...].astype(jnp.bfloat16), wx_ref[...],
                 preferred_element_type=jnp.float32)
         + jnp.dot(c_ref[...].astype(jnp.bfloat16), wc_ref[...],
                   preferred_element_type=jnp.float32)
         + b_in_ref[...])
    # Mish in f32 (portable across v5e/v6e/v7x), activation stored in bf16
    # (halves VMEM activation traffic; the next MXU dot consumes bf16 anyway).
    h = _mish_fast(h).astype(jnp.bfloat16)

    num_hidden_mm = w_h_ref.shape[0]              # static (block shape): n_hidden - 1
    for l in range(num_hidden_mm):                # static unroll
        z = jnp.dot(h, w_h_ref[l], preferred_element_type=jnp.float32) + b_h_ref[l]
        h = _mish_fast(z).astype(jnp.bfloat16)

    out = jnp.dot(h, w_out_ref[...], preferred_element_type=jnp.float32) + b_out_ref[...]
    o_ref[...] = out.astype(o_ref.dtype)


def prepare_params(params, x_dim):
    """One-time param prep: bf16 MXU weights (w_in split into W_x/W_c), f32 biases
    reshaped for broadcasting. Call once at init — NOT per denoiser step."""
    w_in = params["w_in"]
    H = w_in.shape[1]
    L = params["w_h"].shape[0]
    out_dim = params["w_out"].shape[1]
    return {
        "w_x": w_in[:x_dim].astype(jnp.bfloat16),
        "w_c": w_in[x_dim:].astype(jnp.bfloat16),
        "b_in": params["b_in"].reshape(1, H).astype(jnp.float32),
        "w_h": params["w_h"].astype(jnp.bfloat16),
        "b_h": params["b_h"].reshape(L, 1, H).astype(jnp.float32),
        "w_out": params["w_out"].astype(jnp.bfloat16),
        "b_out": params["b_out"].reshape(1, out_dim).astype(jnp.float32),
    }


def conditional_mlp_forward(x, condition, prepared, *, tile_b=2048):
    """x: [B, x_dim], condition: [B, c_dim]; prepared = prepare_params(...)."""
    assert tile_b % 8 == 0
    condition = condition.astype(x.dtype)
    B, x_dim = x.shape
    c_dim = condition.shape[1]

    w_x, w_c = prepared["w_x"], prepared["w_c"]
    b_in, w_h, b_h = prepared["b_in"], prepared["w_h"], prepared["b_h"]
    w_out, b_out = prepared["w_out"], prepared["b_out"]
    H = w_x.shape[1]
    L = w_h.shape[0]
    out_dim = w_out.shape[1]

    # Batch tiling: one full-batch tile for small B (legal: block == full dim),
    # otherwise tile_b with the batch padded to a multiple so every tile is full
    # and the grid has >= 2 steps (lets the "parallel" axis shard across v7x's 2 TCs).
    if B <= tile_b:
        tb, B_pad = B, B
    else:
        tb = tile_b
        B_pad = ((B + tb - 1) // tb) * tb
    if B_pad != B:
        pad = B_pad - B
        x = jnp.pad(x, ((0, pad), (0, 0)))
        condition = jnp.pad(condition, ((0, pad), (0, 0)))
    grid = (B_pad // tb,)

    # VMEM budget: resident bf16 weights + f32 biases (x2 pipeline buffers),
    # double-buffered I/O tiles, and a generous allowance for compiler-held
    # temporaries (f32 pre-activation, Mish intermediates, bf16 activation copy).
    w_bytes = (x_dim * H + c_dim * H + L * H * H + H * out_dim) * 2
    b_bytes = (H + L * H + out_dim) * 4
    io_bytes = 2 * tb * (x_dim + c_dim + out_dim) * 4
    interm_bytes = 6 * tb * H * 4
    vmem_limit = min(2 * (w_bytes + b_bytes) + io_bytes + interm_bytes + (8 << 20),
                     32 << 20)

    n_act = L + 1
    cost = pl.CostEstimate(
        flops=int(2 * B_pad * ((x_dim + c_dim) * H + L * H * H + H * out_dim)),
        transcendentals=int(n_act * B_pad * H),     # one exp per Mish element
        bytes_accessed=int(B_pad * (x_dim + c_dim + out_dim) * 4 + w_bytes + b_bytes),
    )

    out = pl.pallas_call(
        _cond_mlp_kernel,
        out_shape=jax.ShapeDtypeStruct((B_pad, out_dim), x.dtype),
        grid_spec=pltpu.PrefetchScalarGridSpec(
            num_scalar_prefetch=0,
            grid=grid,
            in_specs=[
                pl.BlockSpec((tb, x_dim), lambda i: (i, 0)),      # x tile
                pl.BlockSpec((tb, c_dim), lambda i: (i, 0)),      # condition tile
                pl.BlockSpec((x_dim, H), lambda i: (0, 0)),       # W_x  (resident)
                pl.BlockSpec((c_dim, H), lambda i: (0, 0)),       # W_c  (resident)
                pl.BlockSpec((1, H), lambda i: (0, 0)),           # b_in
                pl.BlockSpec((L, H, H), lambda i: (0, 0, 0)),     # hidden weights (resident)
                pl.BlockSpec((L, 1, H), lambda i: (0, 0, 0)),     # hidden biases
                pl.BlockSpec((H, out_dim), lambda i: (0, 0)),     # W_out (resident)
                pl.BlockSpec((1, out_dim), lambda i: (0, 0)),     # b_out
            ],
            out_specs=pl.BlockSpec((tb, out_dim), lambda i: (i, 0)),
        ),
        compiler_params=pltpu.CompilerParams(
            dimension_semantics=("parallel",),
            vmem_limit_bytes=int(vmem_limit),
        ),
        cost_estimate=cost,
    )(x, condition, w_x, w_c, b_in, w_h, b_h, w_out, b_out)

    return out[:B] if B_pad != B else out


def _linear_init(key, fan_in, fan_out):
    # PyTorch nn.Linear default init: U(-1/sqrt(fan_in), 1/sqrt(fan_in)) for W and b.
    kw, kb = jax.random.split(key)
    bound = 1.0 / (fan_in ** 0.5)
    w = jax.random.uniform(kw, (fan_in, fan_out), jnp.float32, -bound, bound)
    b = jax.random.uniform(kb, (fan_out,), jnp.float32, -bound, bound)
    return w, b


def init_conditional_mlp_params(key, in_dim=4, out_dim=2, hidden_dim=256, n_hidden=4):
    keys = jax.random.split(key, n_hidden)
    w_in, b_in = _linear_init(keys[0], in_dim, hidden_dim)
    w_hs, b_hs = [], []
    for l in range(n_hidden - 1):
        w, b = _linear_init(keys[l + 1], hidden_dim, hidden_dim)
        w_hs.append(w)
        b_hs.append(b)
    # Last linear zero-initialized (weights AND bias), per the module spec.
    w_out = jnp.zeros((hidden_dim, out_dim), jnp.float32)
    b_out = jnp.zeros((out_dim,), jnp.float32)
    return {
        "w_in": w_in, "b_in": b_in,
        "w_h": jnp.stack(w_hs), "b_h": jnp.stack(b_hs),
        "w_out": w_out, "b_out": b_out,
    }


def _mish_reference(v):
    return v * jnp.tanh(jax.nn.softplus(v))


def _reference(x, condition, params):
    inp = jnp.concatenate([x, condition], axis=-1)
    h = _mish_reference(inp @ params["w_in"] + params["b_in"])
    for l in range(params["w_h"].shape[0]):
        h = _mish_reference(h @ params["w_h"][l] + params["b_h"][l])
    return h @ params["w_out"] + params["b_out"]


if __name__ == "__main__":
    # Small shapes consistent with the module defaults:
    # in_dim = 4 (x_dim 2 + condition_dim 2), hidden 256, n_hidden 4, out_dim 2.
    B, x_dim, c_dim = 16, 2, 2
    hidden_dim, n_hidden, out_dim = 256, 4, 2

    key = jax.random.PRNGKey(0)
    kx, kc, kp, ko = jax.random.split(key, 4)

    x = jax.random.normal(kx, (B, x_dim), jnp.float32)
    condition = jax.random.normal(kc, (B, c_dim), jnp.float32)

    fwd = functools.partial(conditional_mlp_forward, tile_b=2048)

    # 1) Spec-faithful params (zero-init last linear, as in the PyTorch module).
    params = init_conditional_mlp_params(kp, in_dim=x_dim + c_dim, out_dim=out_dim,
                                         hidden_dim=hidden_dim, n_hidden=n_hidden)
    prepared = prepare_params(params, x_dim)
    out = jax.block_until_ready(fwd(x, condition, prepared))
    ref = _reference(x, condition, params)
    assert out.shape == (B, out_dim) and out.dtype == x.dtype
    assert jnp.allclose(out, ref, atol=1e-5, rtol=1e-5), "mismatch (zero-init head)"

    # 2) Numerics check with a non-degenerate (random) last linear to exercise the full path.
    kw, kb = jax.random.split(ko)
    params_rand = dict(params)
    params_rand["w_out"] = jax.random.normal(kw, (hidden_dim, out_dim), jnp.float32) * 0.1
    params_rand["b_out"] = jax.random.normal(kb, (out_dim,), jnp.float32) * 0.1
    prepared_rand = prepare_params(params_rand, x_dim)
    out2 = jax.block_until_ready(fwd(x, condition, prepared_rand))
    ref2 = _reference(x, condition, params_rand)
    # bf16 matmul operands (f32 accumulation) + approx-reciprocal Mish => loosened tolerance.
    assert jnp.allclose(out2, ref2, atol=3e-2, rtol=3e-2), "mismatch (random head)"

    print("KERNEL_OK")
</pallas_src>

<mosaic_0001>
module attributes {stable_mosaic.version = 11 : i64} {
  func.func @_cond_mlp_kernel(%arg0: i32, %arg1: memref<16x2xf32, #tpu.memory_space<vmem>>, %arg2: memref<16x2xf32, #tpu.memory_space<vmem>>, %arg3: memref<2x256xbf16, #tpu.memory_space<vmem>>, %arg4: memref<2x256xbf16, #tpu.memory_space<vmem>>, %arg5: memref<1x256xf32, #tpu.memory_space<vmem>>, %arg6: memref<3x256x256xbf16, #tpu.memory_space<vmem>>, %arg7: memref<3x1x256xf32, #tpu.memory_space<vmem>>, %arg8: memref<256x2xbf16, #tpu.memory_space<vmem>>, %arg9: memref<1x2xf32, #tpu.memory_space<vmem>>, %arg10: memref<16x2xf32, #tpu.memory_space<vmem>>) attributes {dimension_semantics = [#tpu.dimension_semantics<parallel>], iteration_bounds = array<i64: 1>, scalar_prefetch = 0 : i64, scratch_operands = 0 : i64, tpu.core_type = #tpu.core_type<tc>, window_params = [{transform_indices = @transform_0, window_bounds = array<i64: 16, 2>}, {transform_indices = @transform_1, window_bounds = array<i64: 16, 2>}, {pipeline_mode = #tpu.pipeline_mode<synchronous>, transform_indices = @transform_2, window_bounds = array<i64: 2, 256>}, {pipeline_mode = #tpu.pipeline_mode<synchronous>, transform_indices = @transform_3, window_bounds = array<i64: 2, 256>}, {pipeline_mode = #tpu.pipeline_mode<synchronous>, transform_indices = @transform_4, window_bounds = array<i64: 1, 256>}, {pipeline_mode = #tpu.pipeline_mode<synchronous>, transform_indices = @transform_5, window_bounds = array<i64: 3, 256, 256>}, {pipeline_mode = #tpu.pipeline_mode<synchronous>, transform_indices = @transform_6, window_bounds = array<i64: 3, 1, 256>}, {pipeline_mode = #tpu.pipeline_mode<synchronous>, transform_indices = @transform_7, window_bounds = array<i64: 256, 2>}, {pipeline_mode = #tpu.pipeline_mode<synchronous>, transform_indices = @transform_8, window_bounds = array<i64: 1, 2>}, {transform_indices = @transform_9, window_bounds = array<i64: 16, 2>}]} {
    %c0 = arith.constant 0 : index
    %c0_0 = arith.constant 0 : index
    %0 = vector.load %arg1[%c0, %c0_0] : memref<16x2xf32, #tpu.memory_space<vmem>>, vector<16x2xf32>
    %1 = arith.truncf %0 : vector<16x2xf32> to vector<16x2xbf16>
    %c0_1 = arith.constant 0 : index
    %c0_2 = arith.constant 0 : index
    %2 = vector.load %arg3[%c0_1, %c0_2] : memref<2x256xbf16, #tpu.memory_space<vmem>>, vector<2x256xbf16>
    %cst = arith.constant dense<0.000000e+00> : vector<16x256xf32>
    %3 = tpu.matmul %1, %2, %cst {dimension_numbers = #tpu.dot_dimension_numbers<[1], [0], [0], [1], [0, 0, 1, 1], [], []>} : vector<16x2xbf16>, vector<2x256xbf16>, vector<16x256xf32> -> vector<16x256xf32>
    %c0_3 = arith.constant 0 : index
    %c0_4 = arith.constant 0 : index
    %4 = vector.load %arg2[%c0_3, %c0_4] : memref<16x2xf32, #tpu.memory_space<vmem>>, vector<16x2xf32>
    %5 = arith.truncf %4 : vector<16x2xf32> to vector<16x2xbf16>
    %c0_5 = arith.constant 0 : index
    %c0_6 = arith.constant 0 : index
    %6 = vector.load %arg4[%c0_5, %c0_6] : memref<2x256xbf16, #tpu.memory_space<vmem>>, vector<2x256xbf16>
    %cst_7 = arith.constant dense<0.000000e+00> : vector<16x256xf32>
    %7 = tpu.matmul %5, %6, %cst_7 {dimension_numbers = #tpu.dot_dimension_numbers<[1], [0], [0], [1], [0, 0, 1, 1], [], []>} : vector<16x2xbf16>, vector<2x256xbf16>, vector<16x256xf32> -> vector<16x256xf32>
    %8 = arith.addf %3, %7 : vector<16x256xf32>
    %c0_8 = arith.constant 0 : index
    %c0_9 = arith.constant 0 : index
    %9 = vector.load %arg5[%c0_8, %c0_9] : memref<1x256xf32, #tpu.memory_space<vmem>>, vector<1x256xf32>
    %10 = vector.broadcast %9 : vector<1x256xf32> to vector<16x256xf32>
    %11 = arith.addf %8, %10 : vector<16x256xf32>
    %cst_10 = arith.constant 3.000000e+01 : f32
    %12 = vector.broadcast %cst_10 : f32 to vector<16x256xf32>
    %13 = arith.minimumf %11, %12 : vector<16x256xf32>
    %14 = math.exp %13 : vector<16x256xf32>
    %cst_11 = arith.constant 2.000000e+00 : f32
    %15 = vector.broadcast %cst_11 : f32 to vector<16x256xf32>
    %16 = arith.addf %14, %15 : vector<16x256xf32>
    %17 = arith.mulf %14, %16 : vector<16x256xf32>
    %cst_12 = arith.constant 2.000000e+00 : f32
    %18 = vector.broadcast %cst_12 : f32 to vector<16x256xf32>
    %19 = arith.addf %17, %18 : vector<16x256xf32>
    %20 = tpu.reciprocal %19 {approx = true} : vector<16x256xf32> -> vector<16x256xf32>
    %21 = arith.mulf %17, %20 : vector<16x256xf32>
    %22 = arith.mulf %11, %21 : vector<16x256xf32>
    %23 = arith.truncf %22 : vector<16x256xf32> to vector<16x256xbf16>
    %c0_13 = arith.constant 0 : index
    %c0_14 = arith.constant 0 : index
    %c0_15 = arith.constant 0 : index
    %24 = vector.load %arg6[%c0_13, %c0_14, %c0_15] : memref<3x256x256xbf16, #tpu.memory_space<vmem>>, vector<1x256x256xbf16>
    %25 = vector.shape_cast %24 : vector<1x256x256xbf16> to vector<256x256xbf16>
    %cst_16 = arith.constant dense<0.000000e+00> : vector<16x256xf32>
    %26 = tpu.matmul %23, %25, %cst_16 {dimension_numbers = #tpu.dot_dimension_numbers<[1], [0], [0], [1], [0, 0, 1, 1], [], []>} : vector<16x256xbf16>, vector<256x256xbf16>, vector<16x256xf32> -> vector<16x256xf32>
    %c0_17 = arith.constant 0 : index
    %c0_18 = arith.constant 0 : index
    %c0_19 = arith.constant 0 : index
    %27 = vector.load %arg7[%c0_17, %c0_18, %c0_19] : memref<3x1x256xf32, #tpu.memory_space<vmem>>, vector<1x1x256xf32>
    %28 = vector.shape_cast %27 : vector<1x1x256xf32> to vector<1x256xf32>
    %29 = vector.broadcast %28 : vector<1x256xf32> to vector<16x256xf32>
    %30 = arith.addf %26, %29 : vector<16x256xf32>
    %cst_20 = arith.constant 3.000000e+01 : f32
    %31 = vector.broadcast %cst_20 : f32 to vector<16x256xf32>
    %32 = arith.minimumf %30, %31 : vector<16x256xf32>
    %33 = math.exp %32 : vector<16x256xf32>
    %cst_21 = arith.constant 2.000000e+00 : f32
    %34 = vector.broadcast %cst_21 : f32 to vector<16x256xf32>
    %35 = arith.addf %33, %34 : vector<16x256xf32>
    %36 = arith.mulf %33, %35 : vector<16x256xf32>
    %cst_22 = arith.constant 2.000000e+00 : f32
    %37 = vector.broadcast %cst_22 : f32 to vector<16x256xf32>
    %38 = arith.addf %36, %37 : vector<16x256xf32>
    %39 = tpu.reciprocal %38 {approx = true} : vector<16x256xf32> -> vector<16x256xf32>
    %40 = arith.mulf %36, %39 : vector<16x256xf32>
    %41 = arith.mulf %30, %40 : vector<16x256xf32>
    %42 = arith.truncf %41 : vector<16x256xf32> to vector<16x256xbf16>
    %c1 = arith.constant 1 : index
    %c0_23 = arith.constant 0 : index
    %c0_24 = arith.constant 0 : index
    %43 = vector.load %arg6[%c1, %c0_23, %c0_24] : memref<3x256x256xbf16, #tpu.memory_space<vmem>>, vector<1x256x256xbf16>
    %44 = vector.shape_cast %43 : vector<1x256x256xbf16> to vector<256x256xbf16>
    %cst_25 = arith.constant dense<0.000000e+00> : vector<16x256xf32>
    %45 = tpu.matmul %42, %44, %cst_25 {dimension_numbers = #tpu.dot_dimension_numbers<[1], [0], [0], [1], [0, 0, 1, 1], [], []>} : vector<16x256xbf16>, vector<256x256xbf16>, vector<16x256xf32> -> vector<16x256xf32>
    %c1_26 = arith.constant 1 : index
    %c0_27 = arith.constant 0 : index
    %c0_28 = arith.constant 0 : index
    %46 = vector.load %arg7[%c1_26, %c0_27, %c0_28] : memref<3x1x256xf32, #tpu.memory_space<vmem>>, vector<1x1x256xf32>
    %47 = vector.shape_cast %46 : vector<1x1x256xf32> to vector<1x256xf32>
    %48 = vector.broadcast %47 : vector<1x256xf32> to vector<16x256xf32>
    %49 = arith.addf %45, %48 : vector<16x256xf32>
    %cst_29 = arith.constant 3.000000e+01 : f32
    %50 = vector.broadcast %cst_29 : f32 to vector<16x256xf32>
    %51 = arith.minimumf %49, %50 : vector<16x256xf32>
    %52 = math.exp %51 : vector<16x256xf32>
    %cst_30 = arith.constant 2.000000e+00 : f32
    %53 = vector.broadcast %cst_30 : f32 to vector<16x256xf32>
    %54 = arith.addf %52, %53 : vector<16x256xf32>
    %55 = arith.mulf %52, %54 : vector<16x256xf32>
    %cst_31 = arith.constant 2.000000e+00 : f32
    %56 = vector.broadcast %cst_31 : f32 to vector<16x256xf32>
    %57 = arith.addf %55, %56 : vector<16x256xf32>
    %58 = tpu.reciprocal %57 {approx = true} : vector<16x256xf32> -> vector<16x256xf32>
    %59 = arith.mulf %55, %58 : vector<16x256xf32>
    %60 = arith.mulf %49, %59 : vector<16x256xf32>
    %61 = arith.truncf %60 : vector<16x256xf32> to vector<16x256xbf16>
    %c2 = arith.constant 2 : index
    %c0_32 = arith.constant 0 : index
    %c0_33 = arith.constant 0 : index
    %62 = vector.load %arg6[%c2, %c0_32, %c0_33] : memref<3x256x256xbf16, #tpu.memory_space<vmem>>, vector<1x256x256xbf16>
    %63 = vector.shape_cast %62 : vector<1x256x256xbf16> to vector<256x256xbf16>
    %cst_34 = arith.constant dense<0.000000e+00> : vector<16x256xf32>
    %64 = tpu.matmul %61, %63, %cst_34 {dimension_numbers = #tpu.dot_dimension_numbers<[1], [0], [0], [1], [0, 0, 1, 1], [], []>} : vector<16x256xbf16>, vector<256x256xbf16>, vector<16x256xf32> -> vector<16x256xf32>
    %c2_35 = arith.constant 2 : index
    %c0_36 = arith.constant 0 : index
    %c0_37 = arith.constant 0 : index
    %65 = vector.load %arg7[%c2_35, %c0_36, %c0_37] : memref<3x1x256xf32, #tpu.memory_space<vmem>>, vector<1x1x256xf32>
    %66 = vector.shape_cast %65 : vector<1x1x256xf32> to vector<1x256xf32>
    %67 = vector.broadcast %66 : vector<1x256xf32> to vector<16x256xf32>
    %68 = arith.addf %64, %67 : vector<16x256xf32>
    %cst_38 = arith.constant 3.000000e+01 : f32
    %69 = vector.broadcast %cst_38 : f32 to vector<16x256xf32>
    %70 = arith.minimumf %68, %69 : vector<16x256xf32>
    %71 = math.exp %70 : vector<16x256xf32>
    %cst_39 = arith.constant 2.000000e+00 : f32
    %72 = vector.broadcast %cst_39 : f32 to vector<16x256xf32>
    %73 = arith.addf %71, %72 : vector<16x256xf32>
    %74 = arith.mulf %71, %73 : vector<16x256xf32>
    %cst_40 = arith.constant 2.000000e+00 : f32
    %75 = vector.broadcast %cst_40 : f32 to vector<16x256xf32>
    %76 = arith.addf %74, %75 : vector<16x256xf32>
    %77 = tpu.reciprocal %76 {approx = true} : vector<16x256xf32> -> vector<16x256xf32>
    %78 = arith.mulf %74, %77 : vector<16x256xf32>
    %79 = arith.mulf %68, %78 : vector<16x256xf32>
    %80 = arith.truncf %79 : vector<16x256xf32> to vector<16x256xbf16>
    %c0_41 = arith.constant 0 : index
    %c0_42 = arith.constant 0 : index
    %81 = vector.load %arg8[%c0_41, %c0_42] : memref<256x2xbf16, #tpu.memory_space<vmem>>, vector<256x2xbf16>
    %cst_43 = arith.constant dense<0.000000e+00> : vector<16x2xf32>
    %82 = tpu.matmul %80, %81, %cst_43 {dimension_numbers = #tpu.dot_dimension_numbers<[1], [0], [0], [1], [0, 0, 1, 1], [], []>} : vector<16x256xbf16>, vector<256x2xbf16>, vector<16x2xf32> -> vector<16x2xf32>
    %c0_44 = arith.constant 0 : index
    %c0_45 = arith.constant 0 : index
    %83 = vector.load %arg9[%c0_44, %c0_45] : memref<1x2xf32, #tpu.memory_space<vmem>>, vector<1x2xf32>
    %84 = vector.broadcast %83 : vector<1x2xf32> to vector<16x2xf32>
    %85 = arith.addf %82, %84 : vector<16x2xf32>
    %c0_46 = arith.constant 0 : index
    %c0_47 = arith.constant 0 : index
    %86 = vector.load %arg10[%c0_46, %c0_47] : memref<16x2xf32, #tpu.memory_space<vmem>>, vector<16x2xf32>
    tpu.vector_store %arg10[%c0_46, %c0_47], %85 {strides = array<i32>} : memref<16x2xf32, #tpu.memory_space<vmem>>, vector<16x2xf32>,
    return
  }
  func.func @transform_0(%arg0: i32) -> (i32, i32) {
    %c0_i32 = arith.constant 0 : i32
    %c0_i32_0 = arith.constant 0 : i32
    return %arg0, %c0_i32 : i32, i32
  }
  func.func @transform_1(%arg0: i32) -> (i32, i32) {
    %c0_i32 = arith.constant 0 : i32
    %c0_i32_0 = arith.constant 0 : i32
    return %arg0, %c0_i32 : i32, i32
  }
  func.func @transform_2(%arg0: i32) -> (i32, i32) {
    %c0_i32 = arith.constant 0 : i32
    %c0_i32_0 = arith.constant 0 : i32
    %c0_i32_1 = arith.constant 0 : i32
    return %c0_i32, %c0_i32_0 : i32, i32
  }
  func.func @transform_3(%arg0: i32) -> (i32, i32) {
    %c0_i32 = arith.constant 0 : i32
    %c0_i32_0 = arith.constant 0 : i32
    %c0_i32_1 = arith.constant 0 : i32
    return %c0_i32, %c0_i32_0 : i32, i32
  }
  func.func @transform_4(%arg0: i32) -> (i32, i32) {
    %c0_i32 = arith.constant 0 : i32
    %c0_i32_0 = arith.constant 0 : i32
    %c0_i32_1 = arith.constant 0 : i32
    return %c0_i32, %c0_i32_0 : i32, i32
  }
  func.func @transform_5(%arg0: i32) -> (i32, i32, i32) {
    %c0_i32 = arith.constant 0 : i32
    %c0_i32_0 = arith.constant 0 : i32
    %c0_i32_1 = arith.constant 0 : i32
    %c0_i32_2 = arith.constant 0 : i32
    return %c0_i32, %c0_i32_0, %c0_i32_1 : i32, i32, i32
  }
  func.func @transform_6(%arg0: i32) -> (i32, i32, i32) {
    %c0_i32 = arith.constant 0 : i32
    %c0_i32_0 = arith.constant 0 : i32
    %c0_i32_1 = arith.constant 0 : i32
    %c0_i32_2 = arith.constant 0 : i32
    return %c0_i32, %c0_i32_0, %c0_i32_1 : i32, i32, i32
  }
  func.func @transform_7(%arg0: i32) -> (i32, i32) {
    %c0_i32 = arith.constant 0 : i32
    %c0_i32_0 = arith.constant 0 : i32
    %c0_i32_1 = arith.constant 0 : i32
    return %c0_i32, %c0_i32_0 : i32, i32
  }
  func.func @transform_8(%arg0: i32) -> (i32, i32) {
    %c0_i32 = arith.constant 0 : i32
    %c0_i32_0 = arith.constant 0 : i32
    %c0_i32_1 = arith.constant 0 : i32
    return %c0_i32, %c0_i32_0 : i32, i32
  }
  func.func @transform_9(%arg0: i32) -> (i32, i32) {
    %c0_i32 = arith.constant 0 : i32
    %c0_i32_0 = arith.constant 0 : i32
    return %arg0, %c0_i32 : i32, i32
  }
}

</mosaic_0001>

<bundles_post_ra>
// kernel: tpu_custom_call.1
= control target key start
LH: loop header
LB: loop body
LE: loop exit
PB: predicated region body
PF: predicated region fallthrough
CT: control target
= control target key end

     0   :  { %14 = vsyncpa [#allocation3], 0  ;;  %s1703_s30 = smov [#allocation2]   ;;  %s1882_s0 = inlined_call_operand.vmem [shape: f32[16,2], index: 0, kind: input, shape index: {}]   ;;  %s1883_s1 = inlined_call_operand.vmem [shape: f32[16,2], index: 1, kind: input, shape index: {}]   ;;  %s1884_s2 = inlined_call_operand.vmem [shape: bf16[2,256], index: 2, kind: input, shape index: {}]   ;;  %s1885_s3 = inlined_call_operand.vmem [shape: bf16[2,256], index: 3, kind: input, shape index: {}]   ;;  %s1886_s4 = inlined_call_operand.vmem [shape: f32[1,256], index: 4, kind: input, shape index: {}]   ;;  %s1887_s5 = inlined_call_operand.hbm [shape: bf16[3,256,256], index: 5, kind: input, shape index: {}]   ;;  %s1888_s6 = inlined_call_operand.vmem [shape: f32[3,1,256], index: 6, kind: input, shape index: {}]   ;;  %s1889_s7 = inlined_call_operand.vmem [shape: bf16[256,2], index: 7, kind: input, shape index: {}]   ;;  %s1890_s8 = inlined_call_operand.vmem [shape: f32[1,2], index: 8, kind: input, shape index: {}]   ;;  %s1891_s9 = inlined_call_operand.vmem [shape: f32[16,2], index: 9, kind: output, shape index: {}]  }
   0x1   :  { %s30_s10 = sshll.u32 %s1703_s30, 4  ;;  %s1679_s13 = scalar_lea.hbm %s1887_s5, 12288  ;;  %s31_s10 = int_to_ptr.vmem [resolvable:$true] %s30_s10 }
   0x2   :  { %p1680_p0 = scmp.ne.s32.totalorder %s1887_s5, %s1679_s13  ;;  %p1683_p1 = scmp.lt.u32.totalorder %s1679_s13, %s1887_s5 }
   0x4   :  { %p1685_p2 = pnand %p1683_p1, %p1680_p0 }
   0x6   :  { %1688 = shalt.err (!%p1685_p2)
}
   0x7   :  { %s1689_s18 = scalar_lea.vmem %s31_s10, 12288  ;;  %p1694_p4 = scmp.lt.s32.totalorder %s31_s10, %s31_s10 }
   0x8   :  { %p1690_p3 = scmp.ne.s32.totalorder %s31_s10, %s1689_s18  ;;  %p1695_p5 = scmp.lt.s32.totalorder %s1689_s18, %s1689_s18 }
   0xa   :  { %p1696_p6 = por %p1695_p5, %p1694_p4 }
   0xc   :  { %p1697_p7 = pnand %p1696_p6, %p1690_p3 }
   0xe   :  { %1700 = shalt.err (!%p1697_p7)
}
   0xf   :  { %s1704_s19 = smov 128   ;;  %s1705_s20 = smov 8  }
  0x10   :  { %36 = dma.hbm_to_vmem [thread:$0]  %s1887_s5, 12288, %s31_s10, [#allocation3], %s1704_s19, %s1704_s19, %s1705_s20  }
  0x11   :  { %1701 = dma.done.wait [#allocation3], 12288  }
  0x12   :  { %1702 = vsyncadd [#allocation3], 4294955008  ;;  %v67_v0 = vlaneseq  ;;  %v1706_v1 = vmov 1966171168   ;;  %v1707_v3 = vmov 0   ;;  %vm82_vm0 = vcmask 1040384  }
  0x13   :  { %v65_v2 = vunpack.c.l.s4 %v1706_v1  ;;  %121 = vmatprep.mubr.bf16.mxu0 %v1707_v3  ;;  %v1303_v7 = vld.sshfl [vmem:[%s1885_s3] sm:$0x11 pattern:$0x75316420]  ;;  %v52_v11 = vld [vmem:[%s1883_s1 + $0x8] sm:$0xff]  ;;  %vm78_vm1 = vcmask 15360  }
  0x14   :  { %v1770_v4 = vshrl.u32 %v67_v0, 7  ;;  %v63_v8 = vcombine.high %v1303_v7, %v1303_v7  ;;  %v51_v10 = vld [vmem:[%s1883_s1] sm:$0xff]  ;;  %v1455_v14 = vld [vmem:[#allocation2 + $0x4] ss:$8 sps:$4 sm:$0xff]   ;;  %v1457_v18 = vld [vmem:[#allocation2] ss:$8 sps:$4 sm:$0xff]  }
  0x15   :  { %v66_v5 = vunpack.c.0.s8 %v65_v2  ;;  %v1306_v12 = vld.sshfl [vmem:[%s1884_s2] sm:$0x11 pattern:$0x75316420]  ;;  %465 = vmatprep.subr.bf16.mxu1 %v1455_v14  ;;  %v1458_v20 = vld [vmem:[#allocation2 + $0x14] ss:$8 sps:$4 sm:$0xff]   ;;  %v53_v21 = vpack.c.bf16 %v52_v11, %v51_v10 }
  0x16   :  { %v140_v13 = vcombine.high %v1306_v12, %v1306_v12  ;;  %466 = vmatpush1.bf16.msra.mxu1 %v1457_v18  ;;  %v1460_v22 = vld [vmem:[#allocation2 + $0x10] ss:$8 sps:$4 sm:$0xff]   ;;  %v1461_v24 = vld [vmem:[#allocation2 + $0x24] ss:$8 sps:$4 sm:$0xff]   ;;  %v1463_v25 = vld [vmem:[#allocation2 + $0x20] ss:$8 sps:$4 sm:$0xff]  }
  0x17   :  { %v69_v6 = vsub.s32 %v66_v5, %v1770_v4  ;;  %467 = vmatprep.subr.bf16.mxu1 %v1458_v20  ;;  %v1464_v26 = vld [vmem:[#allocation2 + $0x34] ss:$8 sps:$4 sm:$0xff]   ;;  %v1466_v27 = vld [vmem:[#allocation2 + $0x30] ss:$8 sps:$4 sm:$0xff]   ;;  %v1467_v30 = vld [vmem:[#allocation2 + $0x44] ss:$8 sps:$4 sm:$0xff]  }
  0x18   :  { %v47_v28 = vld [vmem:[%s1882_s0] sm:$0xff]  ;;  %v48_v29 = vld [vmem:[%s1882_s0 + $0x8] sm:$0xff]  ;;  %v1469_v31 = vld [vmem:[#allocation2 + $0x40] ss:$8 sps:$4 sm:$0xff]   ;;  %v1798_v1 = vsub.s32 0, %v1770_v4 }
  0x19   :  { %v70_v9 = vrot.slane %v1303_v7, %v69_v6  ;;  %v77_v15 = vrot.slane %v63_v8, %v69_v6  ;;  %v147_v17 = vrot.slane %v1306_v12, %v69_v6  ;;  %v154_v19 = vrot.slane %v140_v13, %v69_v6  ;;  %v1470_v33 = vld [vmem:[#allocation2 + $0x54] ss:$8 sps:$4 sm:$0xff]   ;;  %v1472_v34 = vld [vmem:[#allocation2 + $0x50] ss:$8 sps:$4 sm:$0xff]   ;;  %v1473_v35 = vld [vmem:[#allocation2 + $0x64] ss:$8 sps:$4 sm:$0xff]  }
  0x1a   :  { %468 = vmatpush1.bf16.msra.mxu1 %v1460_v22  ;;  %v49_v32 = vpack.c.bf16 %v48_v29, %v47_v28  ;;  %v1475_v36 = vld [vmem:[#allocation2 + $0x60] ss:$8 sps:$4 sm:$0xff]   ;;  %v1476_v37 = vld [vmem:[#allocation2 + $0x74] ss:$8 sps:$4 sm:$0xff]   ;;  %v1478_v38 = vld [vmem:[#allocation2 + $0x70] ss:$8 sps:$4 sm:$0xff]  }
  0x1b   :  { %v84_v16 = vsel %vm82_vm0, %v70_v9, 0  ;;  %1304 = vmatprep.subr.msk.bf16.mxu0 %vm82_vm0, %v77_v15  ;;  %v159_v23 = vsel %vm82_vm0, %v147_v17, 0  ;;  %469 = vmatprep.subr.bf16.mxu1 %v1461_v24  ;;  %v1479_v39 = vld [vmem:[#allocation2 + $0x84] ss:$8 sps:$4 sm:$0xff]   ;;  %v1481_v40 = vld [vmem:[#allocation2 + $0x80] ss:$8 sps:$4 sm:$0xff]  }
  0x1c   :  { %90 = vmatpush1.bf16.msra.mxu0 %v84_v16  ;;  %v1482_v41 = vld [vmem:[#allocation2 + $0x94] ss:$8 sps:$4 sm:$0xff]   ;;  %v1484_v42 = vld [vmem:[#allocation2 + $0x90] ss:$8 sps:$4 sm:$0xff]   ;;  %v1485_v43 = vld [vmem:[#allocation2 + $0xa4] ss:$8 sps:$4 sm:$0xff]  }
  0x1d   :  { %1307 = vmatprep.subr.msk.bf16.mxu0 %vm82_vm0, %v154_v19  ;;  %v1487_v44 = vld [vmem:[#allocation2 + $0xa0] ss:$8 sps:$4 sm:$0xff]   ;;  %v1488_v45 = vld [vmem:[#allocation2 + $0xb4] ss:$8 sps:$4 sm:$0xff]   ;;  %v1490_v46 = vld [vmem:[#allocation2 + $0xb0] ss:$8 sps:$4 sm:$0xff]  }
  0x1e   :  { %470 = vmatpush1.bf16.msra.mxu1 %v1463_v25  ;;  %v1491_v47 = vld [vmem:[#allocation2 + $0xc4] ss:$8 sps:$4 sm:$0xff]   ;;  %v1493_v48 = vld [vmem:[#allocation2 + $0xc0] ss:$8 sps:$4 sm:$0xff]   ;;  %v1494_v49 = vld [vmem:[#allocation2 + $0xd4] ss:$8 sps:$4 sm:$0xff]  }
  0x1f   :  { %1305 = vmatmul.mubr.msk.bf16.vlgmr.msra.gmra.mrb[0].mxu0 %vm78_vm1, %v53_v21  ;;  %471 = vmatprep.subr.bf16.mxu1 %v1464_v26  ;;  %v1496_v50 = vld [vmem:[#allocation2 + $0xd0] ss:$8 sps:$4 sm:$0xff]   ;;  %v1497_v51 = vld [vmem:[#allocation2 + $0xe4] ss:$8 sps:$4 sm:$0xff]   ;;  %v1499_v52 = vld [vmem:[#allocation2 + $0xe0] ss:$8 sps:$4 sm:$0xff]  }
  0x20   :  { %165 = vmatpush1.bf16.msra.mxu0 %v159_v23  ;;  %196 = vmatprep.mubr.bf16.mxu0 %v1707_v3  ;;  %v1500_v53 = vld [vmem:[#allocation2 + $0xf4] ss:$8 sps:$4 sm:$0xff]   ;;  %v1502_v54 = vld [vmem:[#allocation2 + $0xf0] ss:$8 sps:$4 sm:$0xff]   ;;  %v1503_v55 = vld [vmem:[#allocation2 + $0x100] ss:$8 sps:$4 sm:$0xff]  }
  0x21   :  { %v1505_v56 = vld [vmem:[#allocation2 + $0x104] ss:$8 sps:$4 sm:$0xff]   ;;  %v1508_v57 = vld [vmem:[#allocation2 + $0x114] ss:$8 sps:$4 sm:$0xff]   ;;  %v1506_v58 = vld [vmem:[#allocation2 + $0x110] ss:$8 sps:$4 sm:$0xff]  }
  0x22   :  { %472 = vmatpush1.bf16.msra.mxu1 %v1466_v27  ;;  %752 = vmatprep.subr.bf16.mxu0 %v1505_v56  ;;  %v1511_v59 = vld [vmem:[#allocation2 + $0x124] ss:$8 sps:$4 sm:$0xff]   ;;  %v1509_v60 = vld [vmem:[#allocation2 + $0x120] ss:$8 sps:$4 sm:$0xff]   ;;  %v1514_v61 = vld [vmem:[#allocation2 + $0x134] ss:$8 sps:$4 sm:$0xff]  }
  0x23   :  { %473 = vmatprep.subr.bf16.mxu1 %v1467_v30  ;;  %v1512_v62 = vld [vmem:[#allocation2 + $0x130] ss:$8 sps:$4 sm:$0xff]   ;;  %v1517_v63 = vld [vmem:[#allocation2 + $0x144] ss:$8 sps:$4 sm:$0xff]   ;;  %v1515_v0 = vld [vmem:[#allocation2 + $0x140] ss:$8 sps:$4 sm:$0xff]  }
  0x24   :  { %v207_v2 = vld [vmem:[%s1886_s4] sm:$0x3]  ;;  %v1804_v3 = vsub.s32 1, %v1770_v4  ;;  %v1526_v56 = vld [vmem:[#allocation2 + $0x174] ss:$8 sps:$4 sm:$0xff]  }
  0x25   :  { %v212_v5 = vrot.slane %v207_v2, %v1798_v1 }
  0x26   :  { %474 = vmatpush1.bf16.msra.mxu1 %v1469_v31  ;;  %v216_v6 = vrot.slane %v207_v2, %v1804_v3  ;;  %v1536_v2 = vld [vmem:[#allocation2 + $0x1b0] ss:$8 sps:$4 sm:$0xff]  }
  0x27   :  { %475 = vmatprep.subr.bf16.mxu1 %v1470_v33 }
  0x2a   :  { %476 = vmatpush1.bf16.msra.mxu1 %v1472_v34 }
  0x2b   :  { %1308 = vmatmul.mubr.msk.bf16.vlgmr.msra.gmra.mrb[0].mxu0 %vm78_vm1, %v49_v32  ;;  %477 = vmatprep.subr.bf16.mxu1 %v1473_v35 }
  0x2c   :  { %753 = vmatpush1.bf16.msra.mxu0 %v1503_v55  ;;  %v1521_v55 = vld [vmem:[#allocation2 + $0x160] ss:$8 sps:$4 sm:$0xff]  }
  0x2d   :  { %754 = vmatprep.subr.bf16.mxu0 %v1508_v57  ;;  %v1524_v57 = vld [vmem:[#allocation2 + $0x170] ss:$8 sps:$4 sm:$0xff]  }
  0x2e   :  { %478 = vmatpush1.bf16.msra.mxu1 %v1475_v36 }
  0x2f   :  { %479 = vmatprep.subr.bf16.mxu1 %v1476_v37 }
  0x30   :  { %755 = vmatpush1.bf16.msra.mxu0 %v1506_v58  ;;  %v1529_v58 = vld [vmem:[#allocation2 + $0x184] ss:$8 sps:$4 sm:$0xff]  }
  0x31   :  { %756 = vmatprep.subr.bf16.mxu0 %v1511_v59  ;;  %v1527_v59 = vld [vmem:[#allocation2 + $0x180] ss:$8 sps:$4 sm:$0xff]  }
  0x32   :  { %480 = vmatpush1.bf16.msra.mxu1 %v1478_v38 }
  0x33   :  { %481 = vmatprep.subr.bf16.mxu1 %v1479_v39 }
  0x34   :  { %757 = vmatpush1.bf16.msra.mxu0 %v1509_v60  ;;  %v1532_v60 = vld [vmem:[#allocation2 + $0x194] ss:$8 sps:$4 sm:$0xff]  }
  0x35   :  { %758 = vmatprep.subr.bf16.mxu0 %v1514_v61  ;;  %v1530_v61 = vld [vmem:[#allocation2 + $0x190] ss:$8 sps:$4 sm:$0xff]  }
  0x36   :  { %482 = vmatpush1.bf16.msra.mxu1 %v1481_v40 }
  0x37   :  { %483 = vmatprep.subr.bf16.mxu1 %v1482_v41 }
  0x38   :  { %759 = vmatpush1.bf16.msra.mxu0 %v1512_v62  ;;  %v1535_v62 = vld [vmem:[#allocation2 + $0x1a4] ss:$8 sps:$4 sm:$0xff]  }
  0x39   :  { %760 = vmatprep.subr.bf16.mxu0 %v1517_v63  ;;  %v1533_v63 = vld [vmem:[#allocation2 + $0x1a0] ss:$8 sps:$4 sm:$0xff]  }
  0x3a   :  { %484 = vmatpush1.bf16.msra.mxu1 %v1484_v42 }
  0x3b   :  { %485 = vmatprep.subr.bf16.mxu1 %v1485_v43 }
  0x3c   :  { %761 = vmatpush1.bf16.msra.mxu0 %v1515_v0  ;;  %v1538_v0 = vld [vmem:[#allocation2 + $0x1b4] ss:$8 sps:$4 sm:$0xff]  }
  0x3e   :  { %486 = vmatpush1.bf16.msra.mxu1 %v1487_v44 }
  0x3f   :  { %487 = vmatprep.subr.bf16.mxu1 %v1488_v45 }
  0x42   :  { %488 = vmatpush1.bf16.msra.mxu1 %v1490_v46 }
  0x43   :  { %489 = vmatprep.subr.bf16.mxu1 %v1491_v47 }
  0x46   :  { %490 = vmatpush1.bf16.msra.mxu1 %v1493_v48 }
  0x47   :  { %491 = vmatprep.subr.bf16.mxu1 %v1494_v49 }
  0x4a   :  { %492 = vmatpush1.bf16.msra.mxu1 %v1496_v50 }
  0x4b   :  { %493 = vmatprep.subr.bf16.mxu1 %v1497_v51 }
  0x4e   :  { %494 = vmatpush1.bf16.msra.mxu1 %v1499_v52  ;;  %v1520_v52 = vld [vmem:[#allocation2 + $0x154] ss:$8 sps:$4 sm:$0xff]  }
  0x4f   :  { %495 = vmatprep.subr.bf16.mxu1 %v1500_v53  ;;  %v1518_v53 = vld [vmem:[#allocation2 + $0x150] ss:$8 sps:$4 sm:$0xff]   ;;  %762 = vmatprep.subr.bf16.mxu0 %v1520_v52 }
  0x50   :  { %763 = vmatpush1.bf16.msra.mxu0 %v1518_v53 }
  0x52   :  { %496 = vmatpush1.bf16.msra.mxu1 %v1502_v54  ;;  %v1523_v54 = vld [vmem:[#allocation2 + $0x164] ss:$8 sps:$4 sm:$0xff]  }
  0x53   :  { %764 = vmatprep.subr.bf16.mxu0 %v1523_v54 }
  0x54   :  { %765 = vmatpush1.bf16.msra.mxu0 %v1521_v55 }
  0x55   :  { %766 = vmatprep.subr.bf16.mxu0 %v1526_v56 }
  0x58   :  { %767 = vmatpush1.bf16.msra.mxu0 %v1524_v57 }
  0x59   :  { %768 = vmatprep.subr.bf16.mxu0 %v1529_v58 }
  0x5c   :  { %769 = vmatpush1.bf16.msra.mxu0 %v1527_v59 }
  0x5d   :  { %770 = vmatprep.subr.bf16.mxu0 %v1532_v60 }
  0x60   :  { %771 = vmatpush1.bf16.msra.mxu0 %v1530_v61 }
  0x61   :  { %772 = vmatprep.subr.bf16.mxu0 %v1535_v62 }
  0x64   :  { %773 = vmatpush1.bf16.msra.mxu0 %v1533_v63 }
  0x65   :  { %774 = vmatprep.subr.bf16.mxu0 %v1538_v0 }
  0x68   :  { %775 = vmatpush1.bf16.msra.mxu0 %v1536_v2 }
  0xfe   :  { %v198_v7 = vpop.f32.mrb[0].mxu0 }
  0xff   :  { %v219_v8 = vadd.f32 %v212_v5, %v198_v7  ;;  %v200_v9 = vpop.f32.mrb[1].mxu0  ;;  %v1544_v7 = vld [vmem:[#allocation2 + $0x1d4] ss:$8 sps:$4 sm:$0xff]  }
 0x100   :  { %v220_v10 = vadd.f32 %v216_v6, %v200_v9  ;;  %v202_v11 = vpop.f32.mrb[2].mxu0  ;;  %v1547_v9 = vld [vmem:[#allocation2 + $0x1e4] ss:$8 sps:$4 sm:$0xff]  }
 0x101   :  { %v223_v12 = vmin.f32 %v219_v8, 30.0  ;;  %v221_v13 = vadd.f32 %v212_v5, %v202_v11  ;;  %v204_v14 = vpop.f32.mrb[3].mxu0  ;;  %v1541_v5 = vld [vmem:[#allocation2 + $0x1c4] ss:$8 sps:$4 sm:$0xff]   ;;  %v1550_v11 = vld [vmem:[#allocation2 + $0x1f4] ss:$8 sps:$4 sm:$0xff]  }
 0x102   :  { %v224_v15 = vmin.f32 %v220_v10, 30.0  ;;  %v222_v16 = vadd.f32 %v216_v6, %v204_v14  ;;  %v1539_v6 = vld [vmem:[#allocation2 + $0x1c0] ss:$8 sps:$4 sm:$0xff]   ;;  %776 = vmatprep.subr.bf16.mxu0 %v1541_v5  ;;  %v1553_v14 = vld [vmem:[#allocation2 + $0x204] ss:$8 sps:$4 sm:$0xff]  }
 0x103   :  { %v227_v17 = vmul.f32 1.442695, %v223_v12  ;;  %v225_v18 = vmin.f32 %v221_v13, 30.0  ;;  %777 = vmatpush1.bf16.msra.mxu0 %v1539_v6  ;;  %v1548_v12 = vld [vmem:[#allocation2 + $0x1f0] ss:$8 sps:$4 sm:$0xff]   ;;  %1039 = vmatprep.subr.bf16.mxu1 %v1553_v14 }
 0x104   :  { %v229_v19 = vmul.f32 1.442695, %v224_v15  ;;  %v226_v20 = vmin.f32 %v222_v16, 30.0  ;;  %778 = vmatprep.subr.bf16.mxu0 %v1544_v7  ;;  %v1556_v15 = vld [vmem:[#allocation2 + $0x214] ss:$8 sps:$4 sm:$0xff]  }
 0x105   :  { %1615 = vpow2.f32 %v227_v17  ;;  %v231_v4 = vmul.f32 1.442695, %v225_v18  ;;  %v1559_v17 = vld [vmem:[#allocation2 + $0x224] ss:$8 sps:$4 sm:$0xff]   ;;  %v1557_v18 = vld [vmem:[#allocation2 + $0x220] ss:$8 sps:$4 sm:$0xff]  }
 0x106   :  { %1617 = vpow2.f32 %v229_v19  ;;  %v233_v21 = vmul.f32 1.442695, %v226_v20  ;;  %v1562_v19 = vld [vmem:[#allocation2 + $0x234] ss:$8 sps:$4 sm:$0xff]   ;;  %v1560_v20 = vld [vmem:[#allocation2 + $0x230] ss:$8 sps:$4 sm:$0xff]  }
 0x107   :  { %1619 = vpow2.f32 %v231_v4  ;;  %v1565_v4 = vld [vmem:[#allocation2 + $0x244] ss:$8 sps:$4 sm:$0xff]   ;;  %v1574_v14 = vld [vmem:[#allocation2 + $0x274] ss:$8 sps:$4 sm:$0xff]  }
 0x108   :  { %1621 = vpow2.f32 %v233_v21  ;;  %v1563_v21 = vld [vmem:[#allocation2 + $0x240] ss:$8 sps:$4 sm:$0xff]  }
 0x10f   :  { %v1616_v22 = vpop.eup %1615 }
 0x110   :  { %v1618_v23 = vpop.eup %1617  ;;  %v235_v24 = vadd.f32 2.0, %v1616_v22 }
 0x111   :  { %v1620_v25 = vpop.eup %1619  ;;  %v236_v26 = vadd.f32 2.0, %v1618_v23 }
 0x112   :  { %v1622_v27 = vpop.eup %1621  ;;  %v239_v28 = vmul.f32 %v1616_v22, %v235_v24  ;;  %v237_v29 = vadd.f32 2.0, %v1620_v25  ;;  %v293_v22 = vld [vmem:[%s1888_s6] sm:$0x3] }
 0x113   :  { %v238_v30 = vadd.f32 2.0, %v1622_v27  ;;  %v240_v31 = vmul.f32 %v1618_v23, %v236_v26  ;;  %v298_v23 = vrot.slane %v293_v22, %v1798_v1  ;;  %v302_v24 = vrot.slane %v293_v22, %v1804_v3  ;;  %v1584_v22 = vld [vmem:[#allocation2 + $0x2b0] ss:$8 sps:$4 sm:$0xff]  }
 0x114   :  { %v243_v32 = vadd.f32 2.0, %v239_v28  ;;  %v241_v33 = vmul.f32 %v1620_v25, %v237_v29 }
 0x115   :  { %v242_v34 = vmul.f32 %v1622_v27, %v238_v30  ;;  %v244_v35 = vadd.f32 2.0, %v240_v31 }
 0x116   :  { %1623 = vrcp.f32 %v243_v32  ;;  %v245_v36 = vadd.f32 2.0, %v241_v33 }
 0x117   :  { %v246_v37 = vadd.f32 2.0, %v242_v34  ;;  %1625 = vrcp.f32 %v244_v35 }
 0x118   :  { %1627 = vrcp.f32 %v245_v36 }
 0x119   :  { %1629 = vrcp.f32 %v246_v37 }
 0x120   :  { %v1624_v38 = vpop.eup %1623 }
 0x121   :  { %v1626_v39 = vpop.eup %1625  ;;  %v251_v40 = vmul.f32 %v1624_v38, %v239_v28 }
 0x122   :  { %v1628_v41 = vpop.eup %1627  ;;  %v252_v42 = vmul.f32 %v1626_v39, %v240_v31 }
 0x123   :  { %v1630_v43 = vpop.eup %1629  ;;  %v253_v44 = vmul.f32 %v1628_v41, %v241_v33  ;;  %v255_v46 = vmul.f32 %v251_v40, %v219_v8  ;;  %v1542_v8 = vld [vmem:[#allocation2 + $0x1d0] ss:$8 sps:$4 sm:$0xff]  }
 0x124   :  { %v254_v45 = vmul.f32 %v1630_v43, %v242_v34  ;;  %v256_v48 = vmul.f32 %v252_v42, %v220_v10  ;;  %779 = vmatpush1.bf16.msra.mxu0 %v1542_v8  ;;  %v1545_v10 = vld [vmem:[#allocation2 + $0x1e0] ss:$8 sps:$4 sm:$0xff]  }
 0x125   :  { %v257_v47 = vmul.f32 %v253_v44, %v221_v13  ;;  %780 = vmatprep.subr.bf16.mxu0 %v1547_v9  ;;  %v1551_v13 = vld [vmem:[#allocation2 + $0x200] ss:$8 sps:$4 sm:$0xff]  }
 0x126   :  { %v258_v49 = vmul.f32 %v254_v45, %v222_v16  ;;  %v1554_v16 = vld [vmem:[#allocation2 + $0x210] ss:$8 sps:$4 sm:$0xff]  }
 0x127   :  { %v259_v50 = vpack.c.bf16 %v257_v47, %v255_v46 }
 0x128   :  { %v260_v51 = vpack.c.bf16 %v258_v49, %v256_v48  ;;  %781 = vmatpush1.bf16.msra.mxu0 %v1545_v10  ;;  %v1568_v10 = vld [vmem:[#allocation2 + $0x254] ss:$8 sps:$4 sm:$0xff]  }
 0x129   :  { %782 = vmatprep.subr.bf16.mxu0 %v1550_v11  ;;  %v1566_v11 = vld [vmem:[#allocation2 + $0x250] ss:$8 sps:$4 sm:$0xff]  }
 0x12a   :  { %497 = vmatprep.mubr.bf16.mxu1 %v260_v51 }
 0x12b   :  { %498 = vmatmul.mubr.bf16.vlgmr.msra.gmra.mrb[0].mxu1 %v259_v50 }
 0x12c   :  { %783 = vmatpush1.bf16.msra.mxu0 %v1548_v12  ;;  %1040 = vmatpush1.bf16.msra.mxu1 %v1551_v13  ;;  %v1571_v12 = vld [vmem:[#allocation2 + $0x264] ss:$8 sps:$4 sm:$0xff]   ;;  %v1569_v13 = vld [vmem:[#allocation2 + $0x260] ss:$8 sps:$4 sm:$0xff]  }
 0x12d   :  { %1041 = vmatprep.subr.bf16.mxu1 %v1556_v15  ;;  %v1572_v15 = vld [vmem:[#allocation2 + $0x270] ss:$8 sps:$4 sm:$0xff]  }
 0x130   :  { %1042 = vmatpush1.bf16.msra.mxu1 %v1554_v16  ;;  %v1577_v16 = vld [vmem:[#allocation2 + $0x284] ss:$8 sps:$4 sm:$0xff]  }
 0x131   :  { %1043 = vmatprep.subr.bf16.mxu1 %v1559_v17  ;;  %v1575_v17 = vld [vmem:[#allocation2 + $0x280] ss:$8 sps:$4 sm:$0xff]  }
 0x134   :  { %1044 = vmatpush1.bf16.msra.mxu1 %v1557_v18  ;;  %v1580_v18 = vld [vmem:[#allocation2 + $0x294] ss:$8 sps:$4 sm:$0xff]  }
 0x135   :  { %1045 = vmatprep.subr.bf16.mxu1 %v1562_v19  ;;  %v1578_v19 = vld [vmem:[#allocation2 + $0x290] ss:$8 sps:$4 sm:$0xff]  }
 0x138   :  { %1046 = vmatpush1.bf16.msra.mxu1 %v1560_v20  ;;  %v1583_v20 = vld [vmem:[#allocation2 + $0x2a4] ss:$8 sps:$4 sm:$0xff]  }
 0x139   :  { %1047 = vmatprep.subr.bf16.mxu1 %v1565_v4  ;;  %v1581_v4 = vld [vmem:[#allocation2 + $0x2a0] ss:$8 sps:$4 sm:$0xff]  }
 0x13c   :  { %1048 = vmatpush1.bf16.msra.mxu1 %v1563_v21  ;;  %v1586_v21 = vld [vmem:[#allocation2 + $0x2b4] ss:$8 sps:$4 sm:$0xff]  }
 0x13d   :  { %1049 = vmatprep.subr.bf16.mxu1 %v1568_v10 }
 0x140   :  { %1050 = vmatpush1.bf16.msra.mxu1 %v1566_v11 }
 0x141   :  { %1051 = vmatprep.subr.bf16.mxu1 %v1571_v12 }
 0x144   :  { %1052 = vmatpush1.bf16.msra.mxu1 %v1569_v13 }
 0x145   :  { %1053 = vmatprep.subr.bf16.mxu1 %v1574_v14 }
 0x148   :  { %1054 = vmatpush1.bf16.msra.mxu1 %v1572_v15 }
 0x149   :  { %1055 = vmatprep.subr.bf16.mxu1 %v1577_v16 }
 0x14c   :  { %1056 = vmatpush1.bf16.msra.mxu1 %v1575_v17 }
 0x14d   :  { %1057 = vmatprep.subr.bf16.mxu1 %v1580_v18 }
 0x150   :  { %1058 = vmatpush1.bf16.msra.mxu1 %v1578_v19  ;;  %v1599_v19 = vld [vmem:[%s1889_s7 + $0x40] sm:$0xff]  }
 0x151   :  { %1059 = vmatprep.subr.bf16.mxu1 %v1583_v20  ;;  %v1600_v20 = vld [vmem:[%s1889_s7] sm:$0xff]   ;;  %1424 = vmatprep.subr.bf16.mxu0 %v1599_v19 }
 0x154   :  { %1060 = vmatpush1.bf16.msra.mxu1 %v1581_v4  ;;  %v1601_v4 = vld [vmem:[%s1889_s7 + $0x48] sm:$0xff]  }
 0x155   :  { %1061 = vmatprep.subr.bf16.mxu1 %v1586_v21  ;;  %v1602_v21 = vld [vmem:[%s1889_s7 + $0x8] sm:$0xff]  }
 0x158   :  { %1062 = vmatpush1.bf16.msra.mxu1 %v1584_v22  ;;  %v1603_v22 = vld [vmem:[%s1889_s7 + $0x50] sm:$0xff]  }
 0x1fe   :  { %v499_v25 = vpop.f32.mrb[0].mxu1 }
 0x1ff   :  { %v500_v26 = vadd.f32 %v499_v25, %v298_v23  ;;  %v501_v27 = vpop.f32.mrb[1].mxu1  ;;  %v1592_v25 = vld [vmem:[#allocation2 + $0x2d4] ss:$8 sps:$4 sm:$0xff]  }
 0x200   :  { %v502_v28 = vadd.f32 %v501_v27, %v302_v24  ;;  %v503_v29 = vpop.f32.mrb[2].mxu1  ;;  %v1595_v27 = vld [vmem:[#allocation2 + $0x2e4] ss:$8 sps:$4 sm:$0xff]  }
 0x201   :  { %v508_v30 = vmin.f32 %v500_v26, 30.0  ;;  %v504_v31 = vadd.f32 %v503_v29, %v298_v23  ;;  %v505_v32 = vpop.f32.mrb[3].mxu1  ;;  %v1589_v23 = vld [vmem:[#allocation2 + $0x2c4] ss:$8 sps:$4 sm:$0xff]   ;;  %v1598_v29 = vld [vmem:[#allocation2 + $0x2f4] ss:$8 sps:$4 sm:$0xff]  }
 0x202   :  { %v509_v33 = vmin.f32 %v502_v28, 30.0  ;;  %v506_v34 = vadd.f32 %v505_v32, %v302_v24  ;;  %v1587_v24 = vld [vmem:[#allocation2 + $0x2c0] ss:$8 sps:$4 sm:$0xff]   ;;  %1063 = vmatprep.subr.bf16.mxu1 %v1589_v23 }
 0x203   :  { %v512_v35 = vmul.f32 1.442695, %v508_v30  ;;  %v510_v36 = vmin.f32 %v504_v31, 30.0  ;;  %1064 = vmatpush1.bf16.msra.mxu1 %v1587_v24  ;;  %v1596_v30 = vld [vmem:[#allocation2 + $0x2f0] ss:$8 sps:$4 sm:$0xff]   ;;  %v1604_v23 = vld [vmem:[%s1889_s7 + $0x10] sm:$0xff]  }
 0x204   :  { %v514_v37 = vmul.f32 1.442695, %v509_v33  ;;  %v511_v38 = vmin.f32 %v506_v34, 30.0  ;;  %1065 = vmatprep.subr.bf16.mxu1 %v1592_v25  ;;  %v1605_v24 = vld [vmem:[%s1889_s7 + $0x58] sm:$0xff]  }
 0x205   :  { %1631 = vpow2.f32 %v512_v35  ;;  %v516_v39 = vmul.f32 1.442695, %v510_v36  ;;  %v1606_v25 = vld [vmem:[%s1889_s7 + $0x18] sm:$0xff]  }
 0x206   :  { %1633 = vpow2.f32 %v514_v37  ;;  %v518_v40 = vmul.f32 1.442695, %v511_v38 }
 0x207   :  { %1635 = vpow2.f32 %v516_v39 }
 0x208   :  { %1637 = vpow2.f32 %v518_v40 }
 0x20f   :  { %v1632_v41 = vpop.eup %1631 }
 0x210   :  { %v1634_v42 = vpop.eup %1633  ;;  %v520_v43 = vadd.f32 2.0, %v1632_v41 }
 0x211   :  { %v1636_v44 = vpop.eup %1635  ;;  %v521_v45 = vadd.f32 2.0, %v1634_v42 }
 0x212   :  { %v1638_v46 = vpop.eup %1637  ;;  %v524_v47 = vmul.f32 %v1632_v41, %v520_v43  ;;  %v522_v48 = vadd.f32 2.0, %v1636_v44 }
 0x213   :  { %v525_v49 = vmul.f32 %v1634_v42, %v521_v45  ;;  %v523_v50 = vadd.f32 2.0, %v1638_v46 }
 0x214   :  { %v528_v51 = vadd.f32 2.0, %v524_v47  ;;  %v526_v52 = vmul.f32 %v1636_v44, %v522_v48 }
 0x215   :  { %v529_v53 = vadd.f32 2.0, %v525_v49  ;;  %v527_v54 = vmul.f32 %v1638_v46, %v523_v50 }
 0x216   :  { %1639 = vrcp.f32 %v528_v51  ;;  %v530_v55 = vadd.f32 2.0, %v526_v52 }
 0x217   :  { %1641 = vrcp.f32 %v529_v53  ;;  %v531_v56 = vadd.f32 2.0, %v527_v54 }
 0x218   :  { %1643 = vrcp.f32 %v530_v55 }
 0x219   :  { %1645 = vrcp.f32 %v531_v56 }
 0x220   :  { %v1640_v57 = vpop.eup %1639 }
 0x221   :  { %v1642_v58 = vpop.eup %1641  ;;  %v536_v59 = vmul.f32 %v1640_v57, %v524_v47 }
 0x222   :  { %v1644_v60 = vpop.eup %1643  ;;  %v537_v61 = vmul.f32 %v1642_v58, %v525_v49 }
 0x223   :  { %v1646_v62 = vpop.eup %1645  ;;  %v538_v63 = vmul.f32 %v1644_v60, %v526_v52  ;;  %v540_v2 = vmul.f32 %v536_v59, %v500_v26  ;;  %v1590_v26 = vld [vmem:[#allocation2 + $0x2d0] ss:$8 sps:$4 sm:$0xff]  }
 0x224   :  { %v539_v0 = vmul.f32 %v1646_v62, %v527_v54  ;;  %v541_v6 = vmul.f32 %v537_v61, %v502_v28  ;;  %1066 = vmatpush1.bf16.msra.mxu1 %v1590_v26  ;;  %v1593_v28 = vld [vmem:[#allocation2 + $0x2e0] ss:$8 sps:$4 sm:$0xff]   ;;  %v1607_v26 = vld [vmem:[%s1889_s7 + $0x60] sm:$0xff]  }
 0x225   :  { %v542_v5 = vmul.f32 %v538_v63, %v504_v31  ;;  %1067 = vmatprep.subr.bf16.mxu1 %v1595_v27  ;;  %v1341_v31 = vld [vmem:[%s1888_s6 + $0x2] sm:$0x3] }
 0x226   :  { %v543_v7 = vmul.f32 %v539_v0, %v506_v34  ;;  %v585_v32 = vrot.slane %v1341_v31, %v1798_v1  ;;  %v589_v33 = vrot.slane %v1341_v31, %v1804_v3  ;;  %v1608_v27 = vld [vmem:[%s1889_s7 + $0x20] sm:$0xff]   ;;  %v1612_v31 = vld [vmem:[%s1889_s7 + $0x30] sm:$0xff]  }
 0x227   :  { %v544_v8 = vpack.c.bf16 %v542_v5, %v540_v2 }
 0x228   :  { %v545_v9 = vpack.c.bf16 %v543_v7, %v541_v6  ;;  %1068 = vmatpush1.bf16.msra.mxu1 %v1593_v28  ;;  %v1609_v28 = vld [vmem:[%s1889_s7 + $0x68] sm:$0xff]  }
 0x229   :  { %1069 = vmatprep.subr.bf16.mxu1 %v1598_v29  ;;  %v1610_v29 = vld [vmem:[%s1889_s7 + $0x28] sm:$0xff]  }
 0x22a   :  { %784 = vmatprep.mubr.bf16.mxu0 %v545_v9 }
 0x22b   :  { %785 = vmatmul.mubr.bf16.vlgmr.msra.gmra.mrb[4].mxu0 %v544_v8 }
 0x22c   :  { %1070 = vmatpush1.bf16.msra.mxu1 %v1596_v30  ;;  %1425 = vmatpush3.bf16.msra.mxu0 %v1600_v20  ;;  %v1611_v30 = vld [vmem:[%s1889_s7 + $0x70] sm:$0xff]  }
 0x22d   :  { %1426 = vmatprep.subr.bf16.mxu0 %v1601_v4  ;;  %v1407_v4 = vld [vmem:[%s1890_s8] ss:$0 sm:$0xff] }
 0x230   :  { %1427 = vmatpush3.bf16.msra.mxu0 %v1602_v21 }
 0x231   :  { %1428 = vmatprep.subr.bf16.mxu0 %v1603_v22 }
 0x234   :  { %1429 = vmatpush3.bf16.msra.mxu0 %v1604_v23 }
 0x235   :  { %1430 = vmatprep.subr.bf16.mxu0 %v1605_v24 }
 0x238   :  { %1431 = vmatpush3.bf16.msra.mxu0 %v1606_v25 }
 0x239   :  { %1432 = vmatprep.subr.bf16.mxu0 %v1607_v26 }
 0x23c   :  { %1433 = vmatpush3.bf16.msra.mxu0 %v1608_v27 }
 0x23d   :  { %1434 = vmatprep.subr.bf16.mxu0 %v1609_v28 }
 0x240   :  { %1435 = vmatpush3.bf16.msra.mxu0 %v1610_v29 }
 0x241   :  { %1436 = vmatprep.subr.bf16.mxu0 %v1611_v30 }
 0x244   :  { %1437 = vmatpush3.bf16.msra.mxu0 %v1612_v31 }
 0x2fe   :  { %v786_v34 = vpop.f32.mrb[4].mxu0 }
 0x2ff   :  { %v787_v35 = vadd.f32 %v786_v34, %v585_v32  ;;  %v788_v36 = vpop.f32.mrb[5].mxu0  ;;  %v1374_v34 = vld [vmem:[%s1888_s6 + $0x4] sm:$0x3] }
 0x300   :  { %v789_v37 = vadd.f32 %v788_v36, %v589_v33  ;;  %v790_v38 = vpop.f32.mrb[6].mxu0  ;;  %v876_v36 = vrot.slane %v1374_v34, %v1804_v3 }
 0x301   :  { %v795_v39 = vmin.f32 %v787_v35, 30.0  ;;  %v791_v40 = vadd.f32 %v790_v38, %v585_v32  ;;  %v792_v41 = vpop.f32.mrb[7].mxu0  ;;  %v1613_v32 = vld [vmem:[%s1889_s7 + $0x78] sm:$0xff]  }
 0x302   :  { %v796_v42 = vmin.f32 %v789_v37, 30.0  ;;  %v793_v43 = vadd.f32 %v792_v41, %v589_v33  ;;  %v1614_v33 = vld [vmem:[%s1889_s7 + $0x38] sm:$0xff]   ;;  %1438 = vmatprep.subr.bf16.mxu0 %v1613_v32 }
 0x303   :  { %v799_v44 = vmul.f32 1.442695, %v795_v39  ;;  %v797_v45 = vmin.f32 %v791_v40, 30.0  ;;  %1439 = vmatpush3.bf16.msra.mxu0 %v1614_v33 }
 0x304   :  { %v801_v46 = vmul.f32 1.442695, %v796_v42  ;;  %v798_v47 = vmin.f32 %v793_v43, 30.0 }
 0x305   :  { %1647 = vpow2.f32 %v799_v44  ;;  %v803_v48 = vmul.f32 1.442695, %v797_v45 }
 0x306   :  { %1649 = vpow2.f32 %v801_v46  ;;  %v805_v49 = vmul.f32 1.442695, %v798_v47 }
 0x307   :  { %1651 = vpow2.f32 %v803_v48 }
 0x308   :  { %1653 = vpow2.f32 %v805_v49 }
 0x30f   :  { %v1648_v50 = vpop.eup %1647 }
 0x310   :  { %v1650_v51 = vpop.eup %1649  ;;  %v807_v52 = vadd.f32 2.0, %v1648_v50 }
 0x311   :  { %v1652_v53 = vpop.eup %1651  ;;  %v808_v54 = vadd.f32 2.0, %v1650_v51 }
 0x312   :  { %v1654_v55 = vpop.eup %1653  ;;  %v811_v56 = vmul.f32 %v1648_v50, %v807_v52  ;;  %v809_v57 = vadd.f32 2.0, %v1652_v53 }
 0x313   :  { %v812_v58 = vmul.f32 %v1650_v51, %v808_v54  ;;  %v810_v59 = vadd.f32 2.0, %v1654_v55 }
 0x314   :  { %v815_v60 = vadd.f32 2.0, %v811_v56  ;;  %v813_v61 = vmul.f32 %v1652_v53, %v809_v57 }
 0x315   :  { %v816_v62 = vadd.f32 2.0, %v812_v58  ;;  %v814_v63 = vmul.f32 %v1654_v55, %v810_v59 }
 0x316   :  { %1655 = vrcp.f32 %v815_v60  ;;  %v817_v0 = vadd.f32 2.0, %v813_v61 }
 0x317   :  { %1657 = vrcp.f32 %v816_v62  ;;  %v818_v2 = vadd.f32 2.0, %v814_v63 }
 0x318   :  { %1659 = vrcp.f32 %v817_v0 }
 0x319   :  { %1661 = vrcp.f32 %v818_v2 }
 0x320   :  { %v1656_v5 = vpop.eup %1655 }
 0x321   :  { %v1658_v6 = vpop.eup %1657  ;;  %v823_v7 = vmul.f32 %v1656_v5, %v811_v56 }
 0x322   :  { %v1660_v8 = vpop.eup %1659  ;;  %v824_v9 = vmul.f32 %v1658_v6, %v812_v58 }
 0x323   :  { %v1662_v10 = vpop.eup %1661  ;;  %v825_v11 = vmul.f32 %v1660_v8, %v813_v61  ;;  %v827_v13 = vmul.f32 %v823_v7, %v787_v35  ;;  %v872_v35 = vrot.slane %v1374_v34, %v1798_v1 }
 0x324   :  { %v826_v12 = vmul.f32 %v1662_v10, %v814_v63  ;;  %v828_v15 = vmul.f32 %v824_v9, %v789_v37 }
 0x325   :  { %v829_v14 = vmul.f32 %v825_v11, %v791_v40 }
 0x326   :  { %v830_v16 = vmul.f32 %v826_v12, %v793_v43 }
 0x327   :  { %v831_v17 = vpack.c.bf16 %v829_v14, %v827_v13 }
 0x328   :  { %v832_v18 = vpack.c.bf16 %v830_v16, %v828_v15 }
 0x32a   :  { %1071 = vmatprep.mubr.bf16.mxu1 %v832_v18 }
 0x32b   :  { %1072 = vmatmul.mubr.bf16.vlgmr.msra.gmra.mrb[4].mxu1 %v831_v17 }
 0x3fe   :  { %v1073_v37 = vpop.f32.mrb[4].mxu1 }
 0x3ff   :  { %v1074_v38 = vadd.f32 %v1073_v37, %v872_v35  ;;  %v1075_v39 = vpop.f32.mrb[5].mxu1 }
 0x400   :  { %v1076_v40 = vadd.f32 %v1075_v39, %v876_v36  ;;  %v1077_v41 = vpop.f32.mrb[6].mxu1 }
 0x401   :  { %v1082_v42 = vmin.f32 %v1074_v38, 30.0  ;;  %v1078_v43 = vadd.f32 %v1077_v41, %v872_v35  ;;  %v1079_v44 = vpop.f32.mrb[7].mxu1 }
 0x402   :  { %v1083_v45 = vmin.f32 %v1076_v40, 30.0  ;;  %v1080_v46 = vadd.f32 %v1079_v44, %v876_v36 }
 0x403   :  { %v1086_v47 = vmul.f32 1.442695, %v1082_v42  ;;  %v1084_v48 = vmin.f32 %v1078_v43, 30.0 }
 0x404   :  { %v1088_v49 = vmul.f32 1.442695, %v1083_v45  ;;  %v1085_v50 = vmin.f32 %v1080_v46, 30.0 }
 0x405   :  { %1663 = vpow2.f32 %v1086_v47  ;;  %v1090_v51 = vmul.f32 1.442695, %v1084_v48 }
 0x406   :  { %1665 = vpow2.f32 %v1088_v49  ;;  %v1092_v1 = vmul.f32 1.442695, %v1085_v50 }
 0x407   :  { %1667 = vpow2.f32 %v1090_v51 }
 0x408   :  { %1669 = vpow2.f32 %v1092_v1 }
 0x40f   :  { %v1664_v3 = vpop.eup %1663 }
 0x410   :  { %v1666_v52 = vpop.eup %1665  ;;  %v1094_v53 = vadd.f32 2.0, %v1664_v3 }
 0x411   :  { %v1668_v54 = vpop.eup %1667  ;;  %v1095_v55 = vadd.f32 2.0, %v1666_v52 }
 0x412   :  { %v1670_v56 = vpop.eup %1669  ;;  %v1098_v57 = vmul.f32 %v1664_v3, %v1094_v53  ;;  %v1096_v58 = vadd.f32 2.0, %v1668_v54 }
 0x413   :  { %v1099_v59 = vmul.f32 %v1666_v52, %v1095_v55  ;;  %v1097_v60 = vadd.f32 2.0, %v1670_v56 }
 0x414   :  { %v1102_v61 = vadd.f32 2.0, %v1098_v57  ;;  %v1100_v62 = vmul.f32 %v1668_v54, %v1096_v58 }
 0x415   :  { %v1103_v63 = vadd.f32 2.0, %v1099_v59  ;;  %v1101_v0 = vmul.f32 %v1670_v56, %v1097_v60 }
 0x416   :  { %1671 = vrcp.f32 %v1102_v61  ;;  %v1104_v2 = vadd.f32 2.0, %v1100_v62 }
 0x417   :  { %1673 = vrcp.f32 %v1103_v63  ;;  %v1105_v5 = vadd.f32 2.0, %v1101_v0 }
 0x418   :  { %1675 = vrcp.f32 %v1104_v2 }
 0x419   :  { %1677 = vrcp.f32 %v1105_v5 }
 0x420   :  { %v1672_v6 = vpop.eup %1671 }
 0x421   :  { %v1674_v7 = vpop.eup %1673  ;;  %v1110_v8 = vmul.f32 %v1672_v6, %v1098_v57 }
 0x422   :  { %v1676_v9 = vpop.eup %1675  ;;  %v1111_v10 = vmul.f32 %v1674_v7, %v1099_v59 }
 0x423   :  { %v1678_v11 = vpop.eup %1677  ;;  %v1112_v12 = vmul.f32 %v1676_v9, %v1100_v62  ;;  %v1114_v14 = vmul.f32 %v1110_v8, %v1074_v38 }
 0x424   :  { %v1113_v13 = vmul.f32 %v1678_v11, %v1101_v0  ;;  %v1115_v16 = vmul.f32 %v1111_v10, %v1076_v40 }
 0x425   :  { %v1116_v15 = vmul.f32 %v1112_v12, %v1078_v43 }
 0x426   :  { %v1117_v17 = vmul.f32 %v1113_v13, %v1080_v46 }
 0x427   :  { %v1118_v18 = vpack.c.bf16 %v1116_v15, %v1114_v14 }
 0x428   :  { %v1119_v19 = vpack.c.bf16 %v1117_v17, %v1115_v16 }
 0x42a   :  { %1287 = vmatprep.mubr.bf16.mxu0 %v1119_v19 }
 0x42b   :  { %1288 = vmatmul.mubr.bf16.vlgmr.msra.gmra.mrb[8].mxu0 %v1118_v18 }
 0x4fe   :  { %v1440_v20 = vpop.f32.mrb[8].mxu0 }
 0x4ff   :  { %v1441_v21 = vpop.f32.mrb[9].mxu0 }
 0x500   :  { %v1442_v22 = vadd.f32 %v1441_v21, %v1440_v20  ;;  %v1443_v23 = vpop.f32.mrb[10].mxu0 }
 0x501   :  { %v1444_v24 = vpop.f32.mrb[11].mxu0 }
 0x502   :  { %v1290_v25 = vadd.f32 %v1442_v22, %v1407_v4  ;;  %v1445_v26 = vadd.f32 %v1444_v24, %v1443_v23 }
 0x504   :  { %1296 = vst.msk [vmem:[%s1891_s9] sm:$0xff] %vm78_vm1, %v1290_v25  ;;  %v1293_v27 = vadd.f32 %v1445_v26, %v1407_v4 }
 0x506   :  { %1297 = vst.msk [vmem:[%s1891_s9 + $0x8] sm:$0xff] %vm78_vm1, %v1293_v27 }
 0x507   :  { %1302 = vsyncpa [#allocation3], 1 }

</bundles_post_ra>
